<compile_context>
chip_gen: v7x
topology: tpu7x:2x2x1
jax: 0.10.0
libtpu: 0.0.40
codegen_flags: <defaults>
</compile_context>

<pallas_src>
import jax
import jax.numpy as jnp
from jax.experimental import pallas as pl
from jax.experimental.pallas import tpu as pltpu


# ----------------------------- Pallas kernel --------------------------------
def encoder_kernel(
    x_ref,                        # [TB, D_in]  bf16  (streamed)
    c_ref,                        # [TB, D_c]   bf16  (streamed once, used twice)
    w1x_ref, w1c_ref, b1_ref,     # [D_in,H], [D_c,H] bf16; [1,H] f32  (input-BN + hidden-BN folded)
    w2h_ref, w2c_ref, b2_ref,     # [H,H],   [D_c,H] bf16; [1,H] f32  (hidden-BN folded)
    wm_ref, bm_ref,               # [H,L] bf16; [1,L] f32
    wv_ref, bv_ref,               # [H,L] bf16; [1,L] f32
    mean_ref,                     # [TB, L] f32
    logv_ref,                     # [TB, L] f32
):
    c = c_ref[...]

    # layer 1: [x_norm, c] @ W1  ==  x @ W1x' + c @ W1c'   (BN folded into weights/bias)
    h1 = (
        jnp.dot(x_ref[...], w1x_ref[...], preferred_element_type=jnp.float32)
        + jnp.dot(c, w1c_ref[...], preferred_element_type=jnp.float32)
        + b1_ref[...]
    )
    h1 = jnp.where(h1 > 0, h1, 0.2 * h1).astype(w2h_ref.dtype)   # LeakyReLU(0.2)

    # layer 2: [h1, c] @ W2  ==  h1 @ W2h' + c @ W2c'
    h2 = (
        jnp.dot(h1, w2h_ref[...], preferred_element_type=jnp.float32)
        + jnp.dot(c, w2c_ref[...], preferred_element_type=jnp.float32)
        + b2_ref[...]
    )
    h2 = jnp.where(h2 > 0, h2, 0.2 * h2).astype(wm_ref.dtype)

    mean_ref[...] = (
        jnp.dot(h2, wm_ref[...], preferred_element_type=jnp.float32) + bm_ref[...]
    )
    logv_ref[...] = (
        jnp.dot(h2, wv_ref[...], preferred_element_type=jnp.float32) + bv_ref[...]
    )


# ------------------------------ small helpers --------------------------------
def _round_up(v, m):
    return (v + m - 1) // m * m


def _device_defaults():
    """Per-generation (max_batch_tile, vmem_limit_bytes)."""
    try:
        kind = jax.devices()[0].device_kind.lower()
    except Exception:
        kind = ""
    if "v7" in kind or "7x" in kind:
        # v7x: 64 MiB physical VMEM, 2 TensorCores -> modest tiles, <= 48 MiB scoped.
        return 512, 48 * 1024 * 1024
    if "v6" in kind:
        return 1024, 100 * 1024 * 1024
    if "v5" in kind:
        return 1024, 64 * 1024 * 1024
    return 512, 48 * 1024 * 1024   # conservative default for unknown chips


# ------------------- one-time parameter folding (hoisted) --------------------
def fold_encoder_params(params, *, eps=1e-3, compute_dtype=jnp.bfloat16):
    """Fold eval-mode BatchNorms into the Linear weights/biases. Call ONCE per
    parameter update; the result is what encoder_forward streams."""
    f32 = jnp.float32

    def fold(gamma, beta, rmean, rvar):          # bn(v) = v * s + t
        s = gamma / jnp.sqrt(rvar + eps)
        t = beta - rmean * s
        return s, t

    sin, tin = fold(params["bn_in_g"], params["bn_in_b"],
                    params["bn_in_mean"], params["bn_in_var"])
    sh, th = fold(params["bn_h_g"], params["bn_h_b"],
                  params["bn_h_mean"], params["bn_h_var"])

    # layer 1: input-BN = row scale/shift of the x-part; hidden-BN = column scale/shift
    w1x = params["w1x"] * sin[:, None] * sh[None, :]
    w1c = params["w1c"] * sh[None, :]
    b1 = (params["b1"] + tin @ params["w1x"]) * sh + th

    # layer 2: hidden-BN folded into split weights / bias
    w2h = params["w2h"] * sh[None, :]
    w2c = params["w2c"] * sh[None, :]
    b2 = params["b2"] * sh + th

    cd = compute_dtype
    return dict(
        w1x=w1x.astype(cd), w1c=w1c.astype(cd), b1=b1.astype(f32)[None, :],
        w2h=w2h.astype(cd), w2c=w2c.astype(cd), b2=b2.astype(f32)[None, :],
        wm=params["wm"].astype(cd), bm=params["bm"].astype(f32)[None, :],
        wv=params["wv"].astype(cd), bv=params["bv"].astype(f32)[None, :],
    )


# --------------------------------- forward -----------------------------------
def encoder_forward(x, c, folded, *, max_batch_tile=None, vmem_limit_bytes=None):
    """x: [B, D_in], c: [B, D_c], folded: output of fold_encoder_params.
    Returns (mean [B, L], log_var [B, L]) in float32."""
    B, d_in = x.shape
    d_c = c.shape[1]
    H = folded["w1x"].shape[1]
    L = folded["wm"].shape[1]
    cd = folded["w1x"].dtype

    def_tile, def_vmem = _device_defaults()
    if max_batch_tile is None:
        max_batch_tile = def_tile
    if vmem_limit_bytes is None:
        vmem_limit_bytes = def_vmem

    # streamed activations in the compute dtype (no-op when upstream already emits bf16)
    x = x.astype(cd)
    c = c.astype(cd)

    # --- batch tile: aligned for the streamed dtype, capped so the 1-D grid has at
    #     least 2 steps whenever possible (keeps both v7x TensorCores busy).
    align = 16 if jnp.dtype(cd).itemsize < 4 else 8
    TB = min(max_batch_tile, _round_up(B, align))
    if B > align:
        TB = min(TB, _round_up(pl.cdiv(B, 2), align))
    if TB >= B:
        TB = B                      # single full-extent block (always a legal block)
    grid = (pl.cdiv(B, TB),)        # ragged last block handled by Pallas (masked stores)

    args = (x, c,
            folded["w1x"], folded["w1c"], folded["b1"],
            folded["w2h"], folded["w2c"], folded["b2"],
            folded["wm"], folded["bm"],
            folded["wv"], folded["bv"])

    def build(resident_pipeline_mode):
        def act_spec(ncols):        # batch-tiled activation / output
            return pl.BlockSpec((TB, ncols), lambda i: (i, 0))

        def res_spec(shape):        # constant block index -> VMEM-resident, no re-DMA
            if resident_pipeline_mode is None:
                return pl.BlockSpec(shape, lambda i: (0, 0))
            return pl.BlockSpec(shape, lambda i: (0, 0),
                                pipeline_mode=resident_pipeline_mode)

        return pl.pallas_call(
            encoder_kernel,
            out_shape=(jax.ShapeDtypeStruct((B, L), jnp.float32),
                       jax.ShapeDtypeStruct((B, L), jnp.float32)),
            grid=grid,
            in_specs=[
                act_spec(d_in),             # x
                act_spec(d_c),              # c
                res_spec((d_in, H)),        # w1x
                res_spec((d_c, H)),         # w1c
                res_spec((1, H)),           # b1
                res_spec((H, H)),           # w2h
                res_spec((d_c, H)),         # w2c
                res_spec((1, H)),           # b2
                res_spec((H, L)),           # wm
                res_spec((1, L)),           # bm
                res_spec((H, L)),           # wv
                res_spec((1, L)),           # bv
            ],
            out_specs=(act_spec(L), act_spec(L)),
            compiler_params=pltpu.CompilerParams(
                dimension_semantics=("parallel",),      # megacore-shard the batch axis
                vmem_limit_bytes=vmem_limit_bytes,
            ),
        )

    # Single-buffer the resident weights (they never change across grid steps);
    # fall back to default double-buffering if this JAX version rejects it.
    try:
        if not hasattr(pl, "Buffered"):
            raise TypeError("pl.Buffered unavailable")
        mean, log_var = build(pl.Buffered(1))(*args)
    except Exception:
        mean, log_var = build(None)(*args)
    return mean, log_var


# ------------------------ deterministic parameter init -----------------------
def init_params(key, input_dim, condition_dim, hidden_dim, latent_dim):
    ks = jax.random.split(key, 12)
    f32 = jnp.float32

    def lin(k, din, dout):
        bound = 1.0 / jnp.sqrt(din)
        kw, kb = jax.random.split(k)
        w = jax.random.uniform(kw, (din, dout), f32, -bound, bound)  # stored [in, out]
        b = jax.random.uniform(kb, (dout,), f32, -bound, bound)
        return w, b

    w1, b1 = lin(ks[0], input_dim + condition_dim, hidden_dim)   # FC_input
    w2, b2 = lin(ks[1], hidden_dim + condition_dim, hidden_dim)  # FC_hidden
    wm, bm = lin(ks[2], hidden_dim, latent_dim)                  # FC_mean
    wv, bv = lin(ks[3], hidden_dim, latent_dim)                  # FC_var

    return dict(
        # split concat weights:  [x_norm, c] @ W1 == x_norm @ W1[:D_in] + c @ W1[D_in:]
        w1x=w1[:input_dim], w1c=w1[input_dim:], b1=b1,
        w2h=w2[:hidden_dim], w2c=w2[hidden_dim:], b2=b2,
        wm=wm, bm=bm, wv=wv, bv=bv,
        # BatchNorm1d(input_dim, eps=1e-3) running stats + affine
        bn_in_g=1.0 + 0.1 * jax.random.normal(ks[4], (input_dim,), f32),
        bn_in_b=0.1 * jax.random.normal(ks[5], (input_dim,), f32),
        bn_in_mean=0.1 * jax.random.normal(ks[6], (input_dim,), f32),
        bn_in_var=jnp.abs(jax.random.normal(ks[7], (input_dim,), f32)) + 0.5,
        # shared BatchNorm1d(hidden_dim, eps=1e-3) running stats + affine
        bn_h_g=1.0 + 0.1 * jax.random.normal(ks[8], (hidden_dim,), f32),
        bn_h_b=0.1 * jax.random.normal(ks[9], (hidden_dim,), f32),
        bn_h_mean=0.1 * jax.random.normal(ks[10], (hidden_dim,), f32),
        bn_h_var=jnp.abs(jax.random.normal(ks[11], (hidden_dim,), f32)) + 0.5,
    )


# ----------------------------- pure-JAX reference ----------------------------
def encoder_ref(x, c, params, eps=1e-3):
    def bn(v, g, b, m, var):
        return (v - m) / jnp.sqrt(var + eps) * g + b

    def lrelu(v):
        return jnp.where(v > 0, v, 0.2 * v)

    xn = bn(x, params["bn_in_g"], params["bn_in_b"],
            params["bn_in_mean"], params["bn_in_var"])
    h1 = xn @ params["w1x"] + c @ params["w1c"] + params["b1"]
    h1 = lrelu(bn(h1, params["bn_h_g"], params["bn_h_b"],
                  params["bn_h_mean"], params["bn_h_var"]))
    h2 = h1 @ params["w2h"] + c @ params["w2c"] + params["b2"]
    h2 = lrelu(bn(h2, params["bn_h_g"], params["bn_h_b"],
                  params["bn_h_mean"], params["bn_h_var"]))
    mean = h2 @ params["wm"] + params["bm"]
    logv = h2 @ params["wv"] + params["bv"]
    return mean, logv


if __name__ == "__main__":
    D_IN, D_C, H, L = 16, 8, 32, 8
    key = jax.random.PRNGKey(0)
    kp, kd = jax.random.split(key)
    params = init_params(kp, D_IN, D_C, H, L)
    folded = fold_encoder_params(params)        # BN folding done ONCE, not per forward

    ok = True
    # (1) tiny batch (grid=(1,))  (2) larger batch exercising a ragged multi-step grid
    for B in (8, 300):
        kx, kc, kd = jax.random.split(kd, 3)
        x = jax.random.normal(kx, (B, D_IN), jnp.float32)
        c = jax.random.normal(kc, (B, D_C), jnp.float32)

        mean, log_var = encoder_forward(x, c, folded)
        jax.block_until_ready((mean, log_var))

        mean_ref, logv_ref = encoder_ref(x, c, params)
        # tolerance widened vs pure-f32 because activations/weights stream as bf16
        # (accumulation stays f32); agreement is typically ~1e-2.
        ok &= bool(jnp.allclose(mean, mean_ref, atol=5e-2, rtol=5e-2))
        ok &= bool(jnp.allclose(log_var, logv_ref, atol=5e-2, rtol=5e-2))
        ok &= mean.shape == (B, L) and log_var.shape == (B, L)

    assert ok
    print("KERNEL_OK")
</pallas_src>

<mosaic_0001>
module attributes {stable_mosaic.version = 11 : i64} {
  func.func @encoder_kernel(%arg0: i32, %arg1: memref<8x16xbf16, #tpu.memory_space<vmem>>, %arg2: memref<8x8xbf16, #tpu.memory_space<vmem>>, %arg3: memref<16x32xbf16, #tpu.memory_space<vmem>>, %arg4: memref<8x32xbf16, #tpu.memory_space<vmem>>, %arg5: memref<1x32xf32, #tpu.memory_space<vmem>>, %arg6: memref<32x32xbf16, #tpu.memory_space<vmem>>, %arg7: memref<8x32xbf16, #tpu.memory_space<vmem>>, %arg8: memref<1x32xf32, #tpu.memory_space<vmem>>, %arg9: memref<32x8xbf16, #tpu.memory_space<vmem>>, %arg10: memref<1x8xf32, #tpu.memory_space<vmem>>, %arg11: memref<32x8xbf16, #tpu.memory_space<vmem>>, %arg12: memref<1x8xf32, #tpu.memory_space<vmem>>, %arg13: memref<8x8xf32, #tpu.memory_space<vmem>>, %arg14: memref<8x8xf32, #tpu.memory_space<vmem>>) attributes {dimension_semantics = [#tpu.dimension_semantics<parallel>], iteration_bounds = array<i64: 1>, scalar_prefetch = 0 : i64, scratch_operands = 0 : i64, tpu.core_type = #tpu.core_type<tc>, window_params = [{transform_indices = @transform_0, window_bounds = array<i64: 8, 16>}, {transform_indices = @transform_1, window_bounds = array<i64: 8, 8>}, {pipeline_mode = #tpu.pipeline_mode<synchronous>, transform_indices = @transform_2, window_bounds = array<i64: 16, 32>}, {pipeline_mode = #tpu.pipeline_mode<synchronous>, transform_indices = @transform_3, window_bounds = array<i64: 8, 32>}, {pipeline_mode = #tpu.pipeline_mode<synchronous>, transform_indices = @transform_4, window_bounds = array<i64: 1, 32>}, {pipeline_mode = #tpu.pipeline_mode<synchronous>, transform_indices = @transform_5, window_bounds = array<i64: 32, 32>}, {pipeline_mode = #tpu.pipeline_mode<synchronous>, transform_indices = @transform_6, window_bounds = array<i64: 8, 32>}, {pipeline_mode = #tpu.pipeline_mode<synchronous>, transform_indices = @transform_7, window_bounds = array<i64: 1, 32>}, {pipeline_mode = #tpu.pipeline_mode<synchronous>, transform_indices = @transform_8, window_bounds = array<i64: 32, 8>}, {pipeline_mode = #tpu.pipeline_mode<synchronous>, transform_indices = @transform_9, window_bounds = array<i64: 1, 8>}, {pipeline_mode = #tpu.pipeline_mode<synchronous>, transform_indices = @transform_10, window_bounds = array<i64: 32, 8>}, {pipeline_mode = #tpu.pipeline_mode<synchronous>, transform_indices = @transform_11, window_bounds = array<i64: 1, 8>}, {transform_indices = @transform_12, window_bounds = array<i64: 8, 8>}, {transform_indices = @transform_13, window_bounds = array<i64: 8, 8>}]} {
    %c0 = arith.constant 0 : index
    %c0_0 = arith.constant 0 : index
    %0 = vector.load %arg2[%c0, %c0_0] : memref<8x8xbf16, #tpu.memory_space<vmem>>, vector<8x8xbf16>
    %c0_1 = arith.constant 0 : index
    %c0_2 = arith.constant 0 : index
    %1 = vector.load %arg1[%c0_1, %c0_2] : memref<8x16xbf16, #tpu.memory_space<vmem>>, vector<8x16xbf16>
    %c0_3 = arith.constant 0 : index
    %c0_4 = arith.constant 0 : index
    %2 = vector.load %arg3[%c0_3, %c0_4] : memref<16x32xbf16, #tpu.memory_space<vmem>>, vector<16x32xbf16>
    %cst = arith.constant dense<0.000000e+00> : vector<8x32xf32>
    %3 = tpu.matmul %1, %2, %cst {dimension_numbers = #tpu.dot_dimension_numbers<[1], [0], [0], [1], [0, 0, 1, 1], [], []>} : vector<8x16xbf16>, vector<16x32xbf16>, vector<8x32xf32> -> vector<8x32xf32>
    %c0_5 = arith.constant 0 : index
    %c0_6 = arith.constant 0 : index
    %4 = vector.load %arg4[%c0_5, %c0_6] : memref<8x32xbf16, #tpu.memory_space<vmem>>, vector<8x32xbf16>
    %cst_7 = arith.constant dense<0.000000e+00> : vector<8x32xf32>
    %5 = tpu.matmul %0, %4, %cst_7 {dimension_numbers = #tpu.dot_dimension_numbers<[1], [0], [0], [1], [0, 0, 1, 1], [], []>} : vector<8x8xbf16>, vector<8x32xbf16>, vector<8x32xf32> -> vector<8x32xf32>
    %6 = arith.addf %3, %5 : vector<8x32xf32>
    %c0_8 = arith.constant 0 : index
    %c0_9 = arith.constant 0 : index
    %7 = vector.load %arg5[%c0_8, %c0_9] : memref<1x32xf32, #tpu.memory_space<vmem>>, vector<1x32xf32>
    %8 = vector.broadcast %7 : vector<1x32xf32> to vector<8x32xf32>
    %9 = arith.addf %6, %8 : vector<8x32xf32>
    %cst_10 = arith.constant 0.000000e+00 : f32
    %10 = vector.broadcast %cst_10 : f32 to vector<8x32xf32>
    %11 = arith.cmpf ogt, %9, %10 : vector<8x32xf32>
    %cst_11 = arith.constant 2.000000e-01 : f32
    %12 = vector.broadcast %cst_11 : f32 to vector<8x32xf32>
    %13 = arith.mulf %12, %9 : vector<8x32xf32>
    %14 = arith.select %11, %9, %13 : vector<8x32xi1>, vector<8x32xf32>
    %15 = arith.truncf %14 : vector<8x32xf32> to vector<8x32xbf16>
    %c0_12 = arith.constant 0 : index
    %c0_13 = arith.constant 0 : index
    %16 = vector.load %arg6[%c0_12, %c0_13] : memref<32x32xbf16, #tpu.memory_space<vmem>>, vector<32x32xbf16>
    %cst_14 = arith.constant dense<0.000000e+00> : vector<8x32xf32>
    %17 = tpu.matmul %15, %16, %cst_14 {dimension_numbers = #tpu.dot_dimension_numbers<[1], [0], [0], [1], [0, 0, 1, 1], [], []>} : vector<8x32xbf16>, vector<32x32xbf16>, vector<8x32xf32> -> vector<8x32xf32>
    %c0_15 = arith.constant 0 : index
    %c0_16 = arith.constant 0 : index
    %18 = vector.load %arg7[%c0_15, %c0_16] : memref<8x32xbf16, #tpu.memory_space<vmem>>, vector<8x32xbf16>
    %cst_17 = arith.constant dense<0.000000e+00> : vector<8x32xf32>
    %19 = tpu.matmul %0, %18, %cst_17 {dimension_numbers = #tpu.dot_dimension_numbers<[1], [0], [0], [1], [0, 0, 1, 1], [], []>} : vector<8x8xbf16>, vector<8x32xbf16>, vector<8x32xf32> -> vector<8x32xf32>
    %20 = arith.addf %17, %19 : vector<8x32xf32>
    %c0_18 = arith.constant 0 : index
    %c0_19 = arith.constant 0 : index
    %21 = vector.load %arg8[%c0_18, %c0_19] : memref<1x32xf32, #tpu.memory_space<vmem>>, vector<1x32xf32>
    %22 = vector.broadcast %21 : vector<1x32xf32> to vector<8x32xf32>
    %23 = arith.addf %20, %22 : vector<8x32xf32>
    %cst_20 = arith.constant 0.000000e+00 : f32
    %24 = vector.broadcast %cst_20 : f32 to vector<8x32xf32>
    %25 = arith.cmpf ogt, %23, %24 : vector<8x32xf32>
    %cst_21 = arith.constant 2.000000e-01 : f32
    %26 = vector.broadcast %cst_21 : f32 to vector<8x32xf32>
    %27 = arith.mulf %26, %23 : vector<8x32xf32>
    %28 = arith.select %25, %23, %27 : vector<8x32xi1>, vector<8x32xf32>
    %29 = arith.truncf %28 : vector<8x32xf32> to vector<8x32xbf16>
    %c0_22 = arith.constant 0 : index
    %c0_23 = arith.constant 0 : index
    %30 = vector.load %arg9[%c0_22, %c0_23] : memref<32x8xbf16, #tpu.memory_space<vmem>>, vector<32x8xbf16>
    %cst_24 = arith.constant dense<0.000000e+00> : vector<8x8xf32>
    %31 = tpu.matmul %29, %30, %cst_24 {dimension_numbers = #tpu.dot_dimension_numbers<[1], [0], [0], [1], [0, 0, 1, 1], [], []>} : vector<8x32xbf16>, vector<32x8xbf16>, vector<8x8xf32> -> vector<8x8xf32>
    %c0_25 = arith.constant 0 : index
    %c0_26 = arith.constant 0 : index
    %32 = vector.load %arg10[%c0_25, %c0_26] : memref<1x8xf32, #tpu.memory_space<vmem>>, vector<1x8xf32>
    %33 = vector.broadcast %32 : vector<1x8xf32> to vector<8x8xf32>
    %34 = arith.addf %31, %33 : vector<8x8xf32>
    %c0_27 = arith.constant 0 : index
    %c0_28 = arith.constant 0 : index
    %35 = vector.load %arg13[%c0_27, %c0_28] : memref<8x8xf32, #tpu.memory_space<vmem>>, vector<8x8xf32>
    tpu.vector_store %arg13[%c0_27, %c0_28], %34 {strides = array<i32>} : memref<8x8xf32, #tpu.memory_space<vmem>>, vector<8x8xf32>,
    %c0_29 = arith.constant 0 : index
    %c0_30 = arith.constant 0 : index
    %36 = vector.load %arg11[%c0_29, %c0_30] : memref<32x8xbf16, #tpu.memory_space<vmem>>, vector<32x8xbf16>
    %cst_31 = arith.constant dense<0.000000e+00> : vector<8x8xf32>
    %37 = tpu.matmul %29, %36, %cst_31 {dimension_numbers = #tpu.dot_dimension_numbers<[1], [0], [0], [1], [0, 0, 1, 1], [], []>} : vector<8x32xbf16>, vector<32x8xbf16>, vector<8x8xf32> -> vector<8x8xf32>
    %c0_32 = arith.constant 0 : index
    %c0_33 = arith.constant 0 : index
    %38 = vector.load %arg12[%c0_32, %c0_33] : memref<1x8xf32, #tpu.memory_space<vmem>>, vector<1x8xf32>
    %39 = vector.broadcast %38 : vector<1x8xf32> to vector<8x8xf32>
    %40 = arith.addf %37, %39 : vector<8x8xf32>
    %c0_34 = arith.constant 0 : index
    %c0_35 = arith.constant 0 : index
    %41 = vector.load %arg14[%c0_34, %c0_35] : memref<8x8xf32, #tpu.memory_space<vmem>>, vector<8x8xf32>
    tpu.vector_store %arg14[%c0_34, %c0_35], %40 {strides = array<i32>} : memref<8x8xf32, #tpu.memory_space<vmem>>, vector<8x8xf32>,
    return
  }
  func.func @transform_0(%arg0: i32) -> (i32, i32) {
    %c0_i32 = arith.constant 0 : i32
    %c0_i32_0 = arith.constant 0 : i32
    return %arg0, %c0_i32 : i32, i32
  }
  func.func @transform_1(%arg0: i32) -> (i32, i32) {
    %c0_i32 = arith.constant 0 : i32
    %c0_i32_0 = arith.constant 0 : i32
    return %arg0, %c0_i32 : i32, i32
  }
  func.func @transform_2(%arg0: i32) -> (i32, i32) {
    %c0_i32 = arith.constant 0 : i32
    %c0_i32_0 = arith.constant 0 : i32
    %c0_i32_1 = arith.constant 0 : i32
    return %c0_i32, %c0_i32_0 : i32, i32
  }
  func.func @transform_3(%arg0: i32) -> (i32, i32) {
    %c0_i32 = arith.constant 0 : i32
    %c0_i32_0 = arith.constant 0 : i32
    %c0_i32_1 = arith.constant 0 : i32
    return %c0_i32, %c0_i32_0 : i32, i32
  }
  func.func @transform_4(%arg0: i32) -> (i32, i32) {
    %c0_i32 = arith.constant 0 : i32
    %c0_i32_0 = arith.constant 0 : i32
    %c0_i32_1 = arith.constant 0 : i32
    return %c0_i32, %c0_i32_0 : i32, i32
  }
  func.func @transform_5(%arg0: i32) -> (i32, i32) {
    %c0_i32 = arith.constant 0 : i32
    %c0_i32_0 = arith.constant 0 : i32
    %c0_i32_1 = arith.constant 0 : i32
    return %c0_i32, %c0_i32_0 : i32, i32
  }
  func.func @transform_6(%arg0: i32) -> (i32, i32) {
    %c0_i32 = arith.constant 0 : i32
    %c0_i32_0 = arith.constant 0 : i32
    %c0_i32_1 = arith.constant 0 : i32
    return %c0_i32, %c0_i32_0 : i32, i32
  }
  func.func @transform_7(%arg0: i32) -> (i32, i32) {
    %c0_i32 = arith.constant 0 : i32
    %c0_i32_0 = arith.constant 0 : i32
    %c0_i32_1 = arith.constant 0 : i32
    return %c0_i32, %c0_i32_0 : i32, i32
  }
  func.func @transform_8(%arg0: i32) -> (i32, i32) {
    %c0_i32 = arith.constant 0 : i32
    %c0_i32_0 = arith.constant 0 : i32
    %c0_i32_1 = arith.constant 0 : i32
    return %c0_i32, %c0_i32_0 : i32, i32
  }
  func.func @transform_9(%arg0: i32) -> (i32, i32) {
    %c0_i32 = arith.constant 0 : i32
    %c0_i32_0 = arith.constant 0 : i32
    %c0_i32_1 = arith.constant 0 : i32
    return %c0_i32, %c0_i32_0 : i32, i32
  }
  func.func @transform_10(%arg0: i32) -> (i32, i32) {
    %c0_i32 = arith.constant 0 : i32
    %c0_i32_0 = arith.constant 0 : i32
    %c0_i32_1 = arith.constant 0 : i32
    return %c0_i32, %c0_i32_0 : i32, i32
  }
  func.func @transform_11(%arg0: i32) -> (i32, i32) {
    %c0_i32 = arith.constant 0 : i32
    %c0_i32_0 = arith.constant 0 : i32
    %c0_i32_1 = arith.constant 0 : i32
    return %c0_i32, %c0_i32_0 : i32, i32
  }
  func.func @transform_12(%arg0: i32) -> (i32, i32) {
    %c0_i32 = arith.constant 0 : i32
    %c0_i32_0 = arith.constant 0 : i32
    return %arg0, %c0_i32 : i32, i32
  }
  func.func @transform_13(%arg0: i32) -> (i32, i32) {
    %c0_i32 = arith.constant 0 : i32
    %c0_i32_0 = arith.constant 0 : i32
    return %arg0, %c0_i32 : i32, i32
  }
}

module attributes {stable_mosaic.version = 11 : i64} {
  func.func @encoder_kernel(%arg0: i32, %arg1: memref<8x16xbf16, #tpu.memory_space<vmem>>, %arg2: memref<8x8xbf16, #tpu.memory_space<vmem>>, %arg3: memref<16x32xbf16, #tpu.memory_space<vmem>>, %arg4: memref<8x32xbf16, #tpu.memory_space<vmem>>, %arg5: memref<1x32xf32, #tpu.memory_space<vmem>>, %arg6: memref<32x32xbf16, #tpu.memory_space<vmem>>, %arg7: memref<8x32xbf16, #tpu.memory_space<vmem>>, %arg8: memref<1x32xf32, #tpu.memory_space<vmem>>, %arg9: memref<32x8xbf16, #tpu.memory_space<vmem>>, %arg10: memref<1x8xf32, #tpu.memory_space<vmem>>, %arg11: memref<32x8xbf16, #tpu.memory_space<vmem>>, %arg12: memref<1x8xf32, #tpu.memory_space<vmem>>, %arg13: memref<8x8xf32, #tpu.memory_space<vmem>>, %arg14: memref<8x8xf32, #tpu.memory_space<vmem>>) attributes {dimension_semantics = [#tpu.dimension_semantics<parallel>], iteration_bounds = array<i64: 1>, scalar_prefetch = 0 : i64, scratch_operands = 0 : i64, tpu.core_type = #tpu.core_type<tc>, window_params = [{transform_indices = @transform_0, window_bounds = array<i64: 8, 16>}, {transform_indices = @transform_1, window_bounds = array<i64: 8, 8>}, {pipeline_mode = #tpu.pipeline_mode<synchronous>, transform_indices = @transform_2, window_bounds = array<i64: 16, 32>}, {pipeline_mode = #tpu.pipeline_mode<synchronous>, transform_indices = @transform_3, window_bounds = array<i64: 8, 32>}, {pipeline_mode = #tpu.pipeline_mode<synchronous>, transform_indices = @transform_4, window_bounds = array<i64: 1, 32>}, {pipeline_mode = #tpu.pipeline_mode<synchronous>, transform_indices = @transform_5, window_bounds = array<i64: 32, 32>}, {pipeline_mode = #tpu.pipeline_mode<synchronous>, transform_indices = @transform_6, window_bounds = array<i64: 8, 32>}, {pipeline_mode = #tpu.pipeline_mode<synchronous>, transform_indices = @transform_7, window_bounds = array<i64: 1, 32>}, {pipeline_mode = #tpu.pipeline_mode<synchronous>, transform_indices = @transform_8, window_bounds = array<i64: 32, 8>}, {pipeline_mode = #tpu.pipeline_mode<synchronous>, transform_indices = @transform_9, window_bounds = array<i64: 1, 8>}, {pipeline_mode = #tpu.pipeline_mode<synchronous>, transform_indices = @transform_10, window_bounds = array<i64: 32, 8>}, {pipeline_mode = #tpu.pipeline_mode<synchronous>, transform_indices = @transform_11, window_bounds = array<i64: 1, 8>}, {transform_indices = @transform_12, window_bounds = array<i64: 8, 8>}, {transform_indices = @transform_13, window_bounds = array<i64: 8, 8>}]} {
    %c0 = arith.constant 0 : index
    %c0_0 = arith.constant 0 : index
    %0 = vector.load %arg2[%c0, %c0_0] : memref<8x8xbf16, #tpu.memory_space<vmem>>, vector<8x8xbf16>
    %c0_1 = arith.constant 0 : index
    %c0_2 = arith.constant 0 : index
    %1 = vector.load %arg1[%c0_1, %c0_2] : memref<8x16xbf16, #tpu.memory_space<vmem>>, vector<8x16xbf16>
    %c0_3 = arith.constant 0 : index
    %c0_4 = arith.constant 0 : index
    %2 = vector.load %arg3[%c0_3, %c0_4] : memref<16x32xbf16, #tpu.memory_space<vmem>>, vector<16x32xbf16>
    %cst = arith.constant dense<0.000000e+00> : vector<8x32xf32>
    %3 = tpu.matmul %1, %2, %cst {dimension_numbers = #tpu.dot_dimension_numbers<[1], [0], [0], [1], [0, 0, 1, 1], [], []>} : vector<8x16xbf16>, vector<16x32xbf16>, vector<8x32xf32> -> vector<8x32xf32>
    %c0_5 = arith.constant 0 : index
    %c0_6 = arith.constant 0 : index
    %4 = vector.load %arg4[%c0_5, %c0_6] : memref<8x32xbf16, #tpu.memory_space<vmem>>, vector<8x32xbf16>
    %cst_7 = arith.constant dense<0.000000e+00> : vector<8x32xf32>
    %5 = tpu.matmul %0, %4, %cst_7 {dimension_numbers = #tpu.dot_dimension_numbers<[1], [0], [0], [1], [0, 0, 1, 1], [], []>} : vector<8x8xbf16>, vector<8x32xbf16>, vector<8x32xf32> -> vector<8x32xf32>
    %6 = arith.addf %3, %5 : vector<8x32xf32>
    %c0_8 = arith.constant 0 : index
    %c0_9 = arith.constant 0 : index
    %7 = vector.load %arg5[%c0_8, %c0_9] : memref<1x32xf32, #tpu.memory_space<vmem>>, vector<1x32xf32>
    %8 = vector.broadcast %7 : vector<1x32xf32> to vector<8x32xf32>
    %9 = arith.addf %6, %8 : vector<8x32xf32>
    %cst_10 = arith.constant 0.000000e+00 : f32
    %10 = vector.broadcast %cst_10 : f32 to vector<8x32xf32>
    %11 = arith.cmpf ogt, %9, %10 : vector<8x32xf32>
    %cst_11 = arith.constant 2.000000e-01 : f32
    %12 = vector.broadcast %cst_11 : f32 to vector<8x32xf32>
    %13 = arith.mulf %12, %9 : vector<8x32xf32>
    %14 = arith.select %11, %9, %13 : vector<8x32xi1>, vector<8x32xf32>
    %15 = arith.truncf %14 : vector<8x32xf32> to vector<8x32xbf16>
    %c0_12 = arith.constant 0 : index
    %c0_13 = arith.constant 0 : index
    %16 = vector.load %arg6[%c0_12, %c0_13] : memref<32x32xbf16, #tpu.memory_space<vmem>>, vector<32x32xbf16>
    %cst_14 = arith.constant dense<0.000000e+00> : vector<8x32xf32>
    %17 = tpu.matmul %15, %16, %cst_14 {dimension_numbers = #tpu.dot_dimension_numbers<[1], [0], [0], [1], [0, 0, 1, 1], [], []>} : vector<8x32xbf16>, vector<32x32xbf16>, vector<8x32xf32> -> vector<8x32xf32>
    %c0_15 = arith.constant 0 : index
    %c0_16 = arith.constant 0 : index
    %18 = vector.load %arg7[%c0_15, %c0_16] : memref<8x32xbf16, #tpu.memory_space<vmem>>, vector<8x32xbf16>
    %cst_17 = arith.constant dense<0.000000e+00> : vector<8x32xf32>
    %19 = tpu.matmul %0, %18, %cst_17 {dimension_numbers = #tpu.dot_dimension_numbers<[1], [0], [0], [1], [0, 0, 1, 1], [], []>} : vector<8x8xbf16>, vector<8x32xbf16>, vector<8x32xf32> -> vector<8x32xf32>
    %20 = arith.addf %17, %19 : vector<8x32xf32>
    %c0_18 = arith.constant 0 : index
    %c0_19 = arith.constant 0 : index
    %21 = vector.load %arg8[%c0_18, %c0_19] : memref<1x32xf32, #tpu.memory_space<vmem>>, vector<1x32xf32>
    %22 = vector.broadcast %21 : vector<1x32xf32> to vector<8x32xf32>
    %23 = arith.addf %20, %22 : vector<8x32xf32>
    %cst_20 = arith.constant 0.000000e+00 : f32
    %24 = vector.broadcast %cst_20 : f32 to vector<8x32xf32>
    %25 = arith.cmpf ogt, %23, %24 : vector<8x32xf32>
    %cst_21 = arith.constant 2.000000e-01 : f32
    %26 = vector.broadcast %cst_21 : f32 to vector<8x32xf32>
    %27 = arith.mulf %26, %23 : vector<8x32xf32>
    %28 = arith.select %25, %23, %27 : vector<8x32xi1>, vector<8x32xf32>
    %29 = arith.truncf %28 : vector<8x32xf32> to vector<8x32xbf16>
    %c0_22 = arith.constant 0 : index
    %c0_23 = arith.constant 0 : index
    %30 = vector.load %arg9[%c0_22, %c0_23] : memref<32x8xbf16, #tpu.memory_space<vmem>>, vector<32x8xbf16>
    %cst_24 = arith.constant dense<0.000000e+00> : vector<8x8xf32>
    %31 = tpu.matmul %29, %30, %cst_24 {dimension_numbers = #tpu.dot_dimension_numbers<[1], [0], [0], [1], [0, 0, 1, 1], [], []>} : vector<8x32xbf16>, vector<32x8xbf16>, vector<8x8xf32> -> vector<8x8xf32>
    %c0_25 = arith.constant 0 : index
    %c0_26 = arith.constant 0 : index
    %32 = vector.load %arg10[%c0_25, %c0_26] : memref<1x8xf32, #tpu.memory_space<vmem>>, vector<1x8xf32>
    %33 = vector.broadcast %32 : vector<1x8xf32> to vector<8x8xf32>
    %34 = arith.addf %31, %33 : vector<8x8xf32>
    %c0_27 = arith.constant 0 : index
    %c0_28 = arith.constant 0 : index
    %35 = vector.load %arg13[%c0_27, %c0_28] : memref<8x8xf32, #tpu.memory_space<vmem>>, vector<8x8xf32>
    tpu.vector_store %arg13[%c0_27, %c0_28], %34 {strides = array<i32>} : memref<8x8xf32, #tpu.memory_space<vmem>>, vector<8x8xf32>,
    %c0_29 = arith.constant 0 : index
    %c0_30 = arith.constant 0 : index
    %36 = vector.load %arg11[%c0_29, %c0_30] : memref<32x8xbf16, #tpu.memory_space<vmem>>, vector<32x8xbf16>
    %cst_31 = arith.constant dense<0.000000e+00> : vector<8x8xf32>
    %37 = tpu.matmul %29, %36, %cst_31 {dimension_numbers = #tpu.dot_dimension_numbers<[1], [0], [0], [1], [0, 0, 1, 1], [], []>} : vector<8x32xbf16>, vector<32x8xbf16>, vector<8x8xf32> -> vector<8x8xf32>
    %c0_32 = arith.constant 0 : index
    %c0_33 = arith.constant 0 : index
    %38 = vector.load %arg12[%c0_32, %c0_33] : memref<1x8xf32, #tpu.memory_space<vmem>>, vector<1x8xf32>
    %39 = vector.broadcast %38 : vector<1x8xf32> to vector<8x8xf32>
    %40 = arith.addf %37, %39 : vector<8x8xf32>
    %c0_34 = arith.constant 0 : index
    %c0_35 = arith.constant 0 : index
    %41 = vector.load %arg14[%c0_34, %c0_35] : memref<8x8xf32, #tpu.memory_space<vmem>>, vector<8x8xf32>
    tpu.vector_store %arg14[%c0_34, %c0_35], %40 {strides = array<i32>} : memref<8x8xf32, #tpu.memory_space<vmem>>, vector<8x8xf32>,
    return
  }
  func.func @transform_0(%arg0: i32) -> (i32, i32) {
    %c0_i32 = arith.constant 0 : i32
    %c0_i32_0 = arith.constant 0 : i32
    return %arg0, %c0_i32 : i32, i32
  }
  func.func @transform_1(%arg0: i32) -> (i32, i32) {
    %c0_i32 = arith.constant 0 : i32
    %c0_i32_0 = arith.constant 0 : i32
    return %arg0, %c0_i32 : i32, i32
  }
  func.func @transform_2(%arg0: i32) -> (i32, i32) {
    %c0_i32 = arith.constant 0 : i32
    %c0_i32_0 = arith.constant 0 : i32
    %c0_i32_1 = arith.constant 0 : i32
    return %c0_i32, %c0_i32_0 : i32, i32
  }
  func.func @transform_3(%arg0: i32) -> (i32, i32) {
    %c0_i32 = arith.constant 0 : i32
    %c0_i32_0 = arith.constant 0 : i32
    %c0_i32_1 = arith.constant 0 : i32
    return %c0_i32, %c0_i32_0 : i32, i32
  }
  func.func @transform_4(%arg0: i32) -> (i32, i32) {
    %c0_i32 = arith.constant 0 : i32
    %c0_i32_0 = arith.constant 0 : i32
    %c0_i32_1 = arith.constant 0 : i32
    return %c0_i32, %c0_i32_0 : i32, i32
  }
  func.func @transform_5(%arg0: i32) -> (i32, i32) {
    %c0_i32 = arith.constant 0 : i32
    %c0_i32_0 = arith.constant 0 : i32
    %c0_i32_1 = arith.constant 0 : i32
    return %c0_i32, %c0_i32_0 : i32, i32
  }
  func.func @transform_6(%arg0: i32) -> (i32, i32) {
    %c0_i32 = arith.constant 0 : i32
    %c0_i32_0 = arith.constant 0 : i32
    %c0_i32_1 = arith.constant 0 : i32
    return %c0_i32, %c0_i32_0 : i32, i32
  }
  func.func @transform_7(%arg0: i32) -> (i32, i32) {
    %c0_i32 = arith.constant 0 : i32
    %c0_i32_0 = arith.constant 0 : i32
    %c0_i32_1 = arith.constant 0 : i32
    return %c0_i32, %c0_i32_0 : i32, i32
  }
  func.func @transform_8(%arg0: i32) -> (i32, i32) {
    %c0_i32 = arith.constant 0 : i32
    %c0_i32_0 = arith.constant 0 : i32
    %c0_i32_1 = arith.constant 0 : i32
    return %c0_i32, %c0_i32_0 : i32, i32
  }
  func.func @transform_9(%arg0: i32) -> (i32, i32) {
    %c0_i32 = arith.constant 0 : i32
    %c0_i32_0 = arith.constant 0 : i32
    %c0_i32_1 = arith.constant 0 : i32
    return %c0_i32, %c0_i32_0 : i32, i32
  }
  func.func @transform_10(%arg0: i32) -> (i32, i32) {
    %c0_i32 = arith.constant 0 : i32
    %c0_i32_0 = arith.constant 0 : i32
    %c0_i32_1 = arith.constant 0 : i32
    return %c0_i32, %c0_i32_0 : i32, i32
  }
  func.func @transform_11(%arg0: i32) -> (i32, i32) {
    %c0_i32 = arith.constant 0 : i32
    %c0_i32_0 = arith.constant 0 : i32
    %c0_i32_1 = arith.constant 0 : i32
    return %c0_i32, %c0_i32_0 : i32, i32
  }
  func.func @transform_12(%arg0: i32) -> (i32, i32) {
    %c0_i32 = arith.constant 0 : i32
    %c0_i32_0 = arith.constant 0 : i32
    return %arg0, %c0_i32 : i32, i32
  }
  func.func @transform_13(%arg0: i32) -> (i32, i32) {
    %c0_i32 = arith.constant 0 : i32
    %c0_i32_0 = arith.constant 0 : i32
    return %arg0, %c0_i32 : i32, i32
  }
}

</mosaic_0001>

<bundles_post_ra>
// kernel: tpu_custom_call.1
= control target key start
LH: loop header
LB: loop body
LE: loop exit
PB: predicated region body
PF: predicated region fallthrough
CT: control target
= control target key end

     0   :  { %19 = vsyncpa [#allocation3], 0  ;;  %vm55_vm0 = vcmask 1043456   ;;  %v569_v2 = vmov 0.0   ;;  %vm51_vm1 = vcmask 64512   ;;  %vm105_vm2 = vcmask 130048   ;;  %s732_s0 = inlined_call_operand.vmem [shape: bf16[8,16], index: 0, kind: input, shape index: {}]   ;;  %s733_s1 = inlined_call_operand.vmem [shape: bf16[8,8], index: 1, kind: input, shape index: {}]   ;;  %s734_s2 = inlined_call_operand.vmem [shape: bf16[16,32], index: 2, kind: input, shape index: {}]   ;;  %s735_s3 = inlined_call_operand.vmem [shape: bf16[8,32], index: 3, kind: input, shape index: {}]   ;;  %s736_s4 = inlined_call_operand.vmem [shape: f32[1,32], index: 4, kind: input, shape index: {}]   ;;  %s737_s5 = inlined_call_operand.vmem [shape: bf16[32,32], index: 5, kind: input, shape index: {}]   ;;  %s738_s6 = inlined_call_operand.vmem [shape: bf16[8,32], index: 6, kind: input, shape index: {}]   ;;  %s739_s7 = inlined_call_operand.vmem [shape: f32[1,32], index: 7, kind: input, shape index: {}]   ;;  %s740_s8 = inlined_call_operand.vmem [shape: bf16[32,8], index: 8, kind: input, shape index: {}]   ;;  %s741_s9 = inlined_call_operand.vmem [shape: f32[1,8], index: 9, kind: input, shape index: {}]   ;;  %s742_s10 = inlined_call_operand.vmem [shape: bf16[32,8], index: 10, kind: input, shape index: {}]   ;;  %s743_s11 = inlined_call_operand.vmem [shape: f32[1,8], index: 11, kind: input, shape index: {}]   ;;  %s744_s12 = inlined_call_operand.hbm [shape: f32[8,8], index: 12, kind: output, shape index: {0}]   ;;  %s745_s13 = inlined_call_operand.hbm [shape: f32[8,8], index: 13, kind: output, shape index: {1}]  }
   0x1   :  { %v50_v0 = vld [vmem:[%s735_s3] sm:$0xf]  ;;  %468 = vmatprep.subr.bf16.mxu0 %v569_v2  ;;  %474 = vmatprep.subr.bf16.mxu1 %v569_v2  ;;  %vm570_vm3 = vmmov 0  }
   0x2   :  { %v165_v1 = vld [vmem:[%s738_s6] sm:$0xf]  ;;  %v57_v3 = vsel %vm55_vm0, %v50_v0, 0  ;;  %470 = vmatprep.mubr.msk.bf16.mxu0 %vm570_vm3, %v569_v2  ;;  %476 = vmatprep.mubr.msk.bf16.mxu1 %vm570_vm3, %v569_v2 }
   0x3   :  { %v167_v4 = vsel %vm55_vm0, %v165_v1, 0  ;;  %469 = vmatpush3.bf16.msra.mxu0 %v57_v3  ;;  %v514_v5 = vld [vmem:[%s734_s2] sm:$0xff]  }
   0x4   :  { %v46_v6 = vld [vmem:[%s733_s1] sm:$0xf]  ;;  %475 = vmatpush3.bf16.msra.mxu1 %v514_v5  ;;  %480 = vmatprep.subr.bf16.mxu0 %v569_v2 }
   0x5   :  { %v47_v7 = vld [vmem:[%s732_s0] sm:$0xf]  ;;  %486 = vmatprep.subr.bf16.mxu1 %v569_v2 }
   0x6   :  { %471 = vmatmul.mubr.msk.bf16.vlgmr.msra.gmra.mrb[0].mxu0 %vm51_vm1, %v46_v6 }
   0x7   :  { %481 = vmatpush3.bf16.msra.mxu0 %v167_v4  ;;  %482 = vmatprep.mubr.msk.bf16.mxu0 %vm570_vm3, %v569_v2 }
   0x8   :  { %477 = vmatmul.mubr.msk.bf16.vlgmr.msra.gmra.mrb[0].mxu1 %vm105_vm2, %v47_v7  ;;  %494 = vmatprep.subr.bf16.mxu0 %v569_v2 }
   0x9   :  { %20 = vsyncpa [#allocation5], 0  ;;  %490 = vmatprep.mubr.msk.bf16.mxu1 %vm570_vm3, %v569_v2  ;;  %v515_v8 = vld [vmem:[%s737_s5] sm:$0xff]   ;;  %v516_v9 = vld [vmem:[%s737_s5 + $0x8] sm:$0xff]   ;;  %vm221_vm5 = vcmask 261120   ;;  %s572_s30 = smov [#allocation4]  }
   0xa   :  { %487 = vmatpush3.bf16.msra.mxu1 %v515_v8  ;;  %v439_v13 = vld [vmem:[%s736_s4] ss:$0 sm:$0xff]  ;;  %v519_v30 = vld [vmem:[%s740_s8 + $0x8] sm:$0xff]   ;;  %s424_s14 = sshll.u32 %s572_s30, 4  ;;  %s699_s14 = int_to_ptr.vmem [resolvable:$true] %s424_s14 }
   0xb   :  { %488 = vmatprep.subr.bf16.mxu1 %v569_v2  ;;  %v517_v28 = vld [vmem:[%s740_s8] sm:$0xff]   ;;  %v520_v31 = vld [vmem:[%s742_s10 + $0x8] sm:$0xff]  }
   0xc   :  { %v518_v29 = vld [vmem:[%s742_s10] sm:$0xff]  }
   0xd   :  { %v444_v33 = vld [vmem:[%s739_s7] ss:$0 sm:$0xff]  ;;  %s571_s7 = smov [#allocation2]  }
   0xe   :  { %483 = vmatmul.mubr.msk.bf16.vlgmr.msra.gmra.mrb[4].mxu0 %vm51_vm1, %v46_v6  ;;  %489 = vmatpush3.bf16.msra.mxu1 %v516_v9  ;;  %v445_v42 = vld [vmem:[%s741_s9] ss:$0 sm:$0xff]  ;;  %s414_s29 = sshll.u32 %s571_s7, 4  ;;  %s415_s29 = int_to_ptr.vmem [resolvable:$true] %s414_s29 }
   0xf   :  { %498 = vmatprep.mubr.msk.bf16.mxu0 %vm570_vm3, %v569_v2  ;;  %502 = vmatprep.subr.bf16.mxu1 %v569_v2  ;;  %v449_v43 = vld [vmem:[%s743_s11] ss:$0 sm:$0xff]  ;;  %s521_s9 = scalar_lea.vmem %s415_s29, 128  ;;  %p526_p1 = scmp.lt.s32.totalorder %s415_s29, %s415_s29 }
  0x10   :  { %495 = vmatpush3.bf16.msra.mxu0 %v517_v28  ;;  %p522_p0 = scmp.ne.s32.totalorder %s415_s29, %s521_s9  ;;  %p527_p2 = scmp.lt.s32.totalorder %s521_s9, %s521_s9 }
  0x11   :  { %496 = vmatprep.subr.bf16.mxu0 %v569_v2 }
  0x12   :  { %p528_p3 = por %p527_p2, %p526_p1 }
  0x14   :  { %497 = vmatpush3.bf16.msra.mxu0 %v519_v30  ;;  %p529_p4 = pnand %p528_p3, %p522_p0 }
  0xd9   :  { %v93_v10 = vpop.f32.mrb[0].mxu0 }
  0xda   :  { %v472_v11 = vpop.f32.mrb[1].mxu0 }
  0xdb   :  { %v143_v12 = vpop.f32.mrb[0].mxu1  ;;  %v96_v14 = vpop.f32.mrb[2].mxu0 }
  0xdc   :  { %v144_v15 = vadd.f32 %v143_v12, %v93_v10  ;;  %v478_v16 = vpop.f32.mrb[1].mxu1  ;;  %v473_v17 = vpop.f32.mrb[3].mxu0 }
  0xdd   :  { %v146_v18 = vpop.f32.mrb[2].mxu1 }
  0xde   :  { %v156_v19 = vadd.f32 %v439_v13, %v144_v15  ;;  %v479_v20 = vpop.f32.mrb[3].mxu1 }
  0xe0   :  { %vm157_vm4 = vcmp.gt.f32.partialorder %v156_v19, 0.0  ;;  %v158_v21 = vmul.f32 0.2, %v156_v19 }
  0xe1   :  { %v203_v22 = vpop.f32.mrb[4].mxu0 }
  0xe2   :  { %v159_v23 = vsel %vm157_vm4, %v156_v19, %v158_v21  ;;  %v484_v24 = vpop.f32.mrb[5].mxu0 }
  0xe3   :  { %v160_v25 = vpack.c.bf16 %v159_v23, %v159_v23  ;;  %v206_v26 = vpop.f32.mrb[6].mxu0 }
  0xe4   :  { %v485_v27 = vpop.f32.mrb[7].mxu0 }
  0xe5   :  { %491 = vmatmul.mubr.msk.bf16.vlgmr.msra.gmra.mrb[4].mxu1 %vm221_vm5, %v160_v25 }
  0xe6   :  { %506 = vmatprep.mubr.msk.bf16.mxu1 %vm570_vm3, %v569_v2  ;;  %503 = vmatpush3.bf16.msra.mxu1 %v518_v29 }
  0xe7   :  { %504 = vmatprep.subr.bf16.mxu1 %v569_v2 }
  0xea   :  { %505 = vmatpush3.bf16.msra.mxu1 %v520_v31 }
 0x1b8   :  { %v259_v32 = vpop.f32.mrb[4].mxu1 }
 0x1b9   :  { %v260_v34 = vadd.f32 %v259_v32, %v203_v22  ;;  %v492_v35 = vpop.f32.mrb[5].mxu1 }
 0x1ba   :  { %v262_v36 = vpop.f32.mrb[6].mxu1 }
 0x1bb   :  { %v272_v37 = vadd.f32 %v444_v33, %v260_v34  ;;  %v493_v38 = vpop.f32.mrb[7].mxu1 }
 0x1bd   :  { %vm273_vm6 = vcmp.gt.f32.partialorder %v272_v37, 0.0  ;;  %v274_v39 = vmul.f32 0.2, %v272_v37 }
 0x1bf   :  { %v275_v40 = vsel %vm273_vm6, %v272_v37, %v274_v39 }
 0x1c0   :  { %v276_v41 = vpack.c.bf16 %v275_v40, %v275_v40 }
 0x1c2   :  { %499 = vmatmul.mubr.msk.bf16.vlgmr.msra.gmra.mrb[8].mxu0 %vm221_vm5, %v276_v41  ;;  %507 = vmatmul.mubr.msk.bf16.vlgmr.msra.gmra.mrb[8].mxu1 %vm221_vm5, %v276_v41 }
 0x295   :  { %v337_v44 = vpop.f32.mrb[8].mxu0  ;;  %v401_v45 = vpop.f32.mrb[8].mxu1 }
 0x296   :  { %v338_v46 = vadd.f32 %v445_v42, %v337_v44  ;;  %v402_v47 = vadd.f32 %v449_v43, %v401_v45  ;;  %v500_v48 = vpop.f32.mrb[9].mxu0  ;;  %v508_v49 = vpop.f32.mrb[9].mxu1 }
 0x297   :  { %v340_v50 = vpop.f32.mrb[10].mxu0  ;;  %v404_v51 = vpop.f32.mrb[10].mxu1 }
 0x298   :  { %343 = vst.msk [vmem:[#allocation2] sm:$0xff] %vm51_vm1, %v338_v46  ;;  %407 = vst.msk [vmem:[#allocation4] sm:$0xff] %vm51_vm1, %v402_v47  ;;  %v501_v52 = vpop.f32.mrb[11].mxu0  ;;  %v509_v53 = vpop.f32.mrb[11].mxu1 }
 0x299   :  { %532 = shalt.err (!%p529_p4)
}
 0x29a   :  { %s533_s3 = scalar_lea.hbm %s744_s12, 128 }
 0x29b   :  { %p534_p5 = scmp.ne.s32.totalorder %s744_s12, %s533_s3  ;;  %p537_p6 = scmp.lt.u32.totalorder %s533_s3, %s744_s12 }
 0x29d   :  { %p539_p7 = pnand %p537_p6, %p534_p5 }
 0x29f   :  { %542 = shalt.err (!%p539_p7)
}
 0x2a0   :  { %417 = dma.vmem_to_hbm [thread:$0]  %s415_s29, 128, %s744_s12, [#allocation3]  }
 0x2a1   :  { %s543_s18 = scalar_lea.vmem %s699_s14, 128  ;;  %p548_p9 = scmp.lt.s32.totalorder %s699_s14, %s699_s14 }
 0x2a2   :  { %p544_p8 = scmp.ne.s32.totalorder %s699_s14, %s543_s18  ;;  %p549_p10 = scmp.lt.s32.totalorder %s543_s18, %s543_s18 }
 0x2a4   :  { %p550_p11 = por %p549_p10, %p548_p9 }
 0x2a6   :  { %p551_p12 = pnand %p550_p11, %p544_p8 }
 0x2a8   :  { %554 = shalt.err (!%p551_p12)
}
 0x2a9   :  { %s555_s19 = scalar_lea.hbm %s745_s13, 128 }
 0x2aa   :  { %p556_p13 = scmp.ne.s32.totalorder %s745_s13, %s555_s19  ;;  %p559_p0 = scmp.lt.u32.totalorder %s555_s19, %s745_s13 }
 0x2ac   :  { %p561_p1 = pnand %p559_p0, %p556_p13 }
 0x2ae   :  { %564 = shalt.err (!%p561_p1)
}
 0x2af   :  { %427 = dma.vmem_to_hbm [thread:$0]  %s699_s14, 128, %s745_s13, [#allocation5]  }
 0x2b0   :  { %565 = dma.done.wait [#allocation3], 128  }
 0x2b1   :  { %566 = vsyncadd [#allocation3], 4294967168 }
 0x2b2   :  { %567 = dma.done.wait [#allocation5], 128  }
 0x2b3   :  { %568 = vsyncadd [#allocation5], 4294967168 }
 0x2b4   :  { %434 = vsyncpa [#allocation3], 1 }
 0x2b5   :  { %435 = vsyncpa [#allocation5], 1 }

// kernel: tpu_custom_call.1
= control target key start
LH: loop header
LB: loop body
LE: loop exit
PB: predicated region body
PF: predicated region fallthrough
CT: control target
= control target key end

     0   :  { %19 = vsyncpa [#allocation3], 0  ;;  %vm55_vm0 = vcmask 1043456   ;;  %v569_v2 = vmov 0.0   ;;  %vm51_vm1 = vcmask 64512   ;;  %vm105_vm2 = vcmask 130048   ;;  %s732_s0 = inlined_call_operand.vmem [shape: bf16[8,16], index: 0, kind: input, shape index: {}]   ;;  %s733_s1 = inlined_call_operand.vmem [shape: bf16[8,8], index: 1, kind: input, shape index: {}]   ;;  %s734_s2 = inlined_call_operand.vmem [shape: bf16[16,32], index: 2, kind: input, shape index: {}]   ;;  %s735_s3 = inlined_call_operand.vmem [shape: bf16[8,32], index: 3, kind: input, shape index: {}]   ;;  %s736_s4 = inlined_call_operand.vmem [shape: f32[1,32], index: 4, kind: input, shape index: {}]   ;;  %s737_s5 = inlined_call_operand.vmem [shape: bf16[32,32], index: 5, kind: input, shape index: {}]   ;;  %s738_s6 = inlined_call_operand.vmem [shape: bf16[8,32], index: 6, kind: input, shape index: {}]   ;;  %s739_s7 = inlined_call_operand.vmem [shape: f32[1,32], index: 7, kind: input, shape index: {}]   ;;  %s740_s8 = inlined_call_operand.vmem [shape: bf16[32,8], index: 8, kind: input, shape index: {}]   ;;  %s741_s9 = inlined_call_operand.vmem [shape: f32[1,8], index: 9, kind: input, shape index: {}]   ;;  %s742_s10 = inlined_call_operand.vmem [shape: bf16[32,8], index: 10, kind: input, shape index: {}]   ;;  %s743_s11 = inlined_call_operand.vmem [shape: f32[1,8], index: 11, kind: input, shape index: {}]   ;;  %s744_s12 = inlined_call_operand.hbm [shape: f32[8,8], index: 12, kind: output, shape index: {0}]   ;;  %s745_s13 = inlined_call_operand.hbm [shape: f32[8,8], index: 13, kind: output, shape index: {1}]  }
   0x1   :  { %v50_v0 = vld [vmem:[%s735_s3] sm:$0xf]  ;;  %468 = vmatprep.subr.bf16.mxu0 %v569_v2  ;;  %474 = vmatprep.subr.bf16.mxu1 %v569_v2  ;;  %vm570_vm3 = vmmov 0  }
   0x2   :  { %v165_v1 = vld [vmem:[%s738_s6] sm:$0xf]  ;;  %v57_v3 = vsel %vm55_vm0, %v50_v0, 0  ;;  %470 = vmatprep.mubr.msk.bf16.mxu0 %vm570_vm3, %v569_v2  ;;  %476 = vmatprep.mubr.msk.bf16.mxu1 %vm570_vm3, %v569_v2 }
   0x3   :  { %v167_v4 = vsel %vm55_vm0, %v165_v1, 0  ;;  %469 = vmatpush3.bf16.msra.mxu0 %v57_v3  ;;  %v514_v5 = vld [vmem:[%s734_s2] sm:$0xff]  }
   0x4   :  { %v46_v6 = vld [vmem:[%s733_s1] sm:$0xf]  ;;  %475 = vmatpush3.bf16.msra.mxu1 %v514_v5  ;;  %480 = vmatprep.subr.bf16.mxu0 %v569_v2 }
   0x5   :  { %v47_v7 = vld [vmem:[%s732_s0] sm:$0xf]  ;;  %486 = vmatprep.subr.bf16.mxu1 %v569_v2 }
   0x6   :  { %471 = vmatmul.mubr.msk.bf16.vlgmr.msra.gmra.mrb[0].mxu0 %vm51_vm1, %v46_v6 }
   0x7   :  { %481 = vmatpush3.bf16.msra.mxu0 %v167_v4  ;;  %482 = vmatprep.mubr.msk.bf16.mxu0 %vm570_vm3, %v569_v2 }
   0x8   :  { %477 = vmatmul.mubr.msk.bf16.vlgmr.msra.gmra.mrb[0].mxu1 %vm105_vm2, %v47_v7  ;;  %494 = vmatprep.subr.bf16.mxu0 %v569_v2 }
   0x9   :  { %20 = vsyncpa [#allocation5], 0  ;;  %490 = vmatprep.mubr.msk.bf16.mxu1 %vm570_vm3, %v569_v2  ;;  %v515_v8 = vld [vmem:[%s737_s5] sm:$0xff]   ;;  %v516_v9 = vld [vmem:[%s737_s5 + $0x8] sm:$0xff]   ;;  %vm221_vm5 = vcmask 261120   ;;  %s572_s30 = smov [#allocation4]  }
   0xa   :  { %487 = vmatpush3.bf16.msra.mxu1 %v515_v8  ;;  %v439_v13 = vld [vmem:[%s736_s4] ss:$0 sm:$0xff]  ;;  %v519_v30 = vld [vmem:[%s740_s8 + $0x8] sm:$0xff]   ;;  %s424_s14 = sshll.u32 %s572_s30, 4  ;;  %s699_s14 = int_to_ptr.vmem [resolvable:$true] %s424_s14 }
   0xb   :  { %488 = vmatprep.subr.bf16.mxu1 %v569_v2  ;;  %v517_v28 = vld [vmem:[%s740_s8] sm:$0xff]   ;;  %v520_v31 = vld [vmem:[%s742_s10 + $0x8] sm:$0xff]  }
   0xc   :  { %v518_v29 = vld [vmem:[%s742_s10] sm:$0xff]  }
   0xd   :  { %v444_v33 = vld [vmem:[%s739_s7] ss:$0 sm:$0xff]  ;;  %s571_s7 = smov [#allocation2]  }
   0xe   :  { %483 = vmatmul.mubr.msk.bf16.vlgmr.msra.gmra.mrb[4].mxu0 %vm51_vm1, %v46_v6  ;;  %489 = vmatpush3.bf16.msra.mxu1 %v516_v9  ;;  %v445_v42 = vld [vmem:[%s741_s9] ss:$0 sm:$0xff]  ;;  %s414_s29 = sshll.u32 %s571_s7, 4  ;;  %s415_s29 = int_to_ptr.vmem [resolvable:$true] %s414_s29 }
   0xf   :  { %498 = vmatprep.mubr.msk.bf16.mxu0 %vm570_vm3, %v569_v2  ;;  %502 = vmatprep.subr.bf16.mxu1 %v569_v2  ;;  %v449_v43 = vld [vmem:[%s743_s11] ss:$0 sm:$0xff]  ;;  %s521_s9 = scalar_lea.vmem %s415_s29, 128  ;;  %p526_p1 = scmp.lt.s32.totalorder %s415_s29, %s415_s29 }
  0x10   :  { %495 = vmatpush3.bf16.msra.mxu0 %v517_v28  ;;  %p522_p0 = scmp.ne.s32.totalorder %s415_s29, %s521_s9  ;;  %p527_p2 = scmp.lt.s32.totalorder %s521_s9, %s521_s9 }
  0x11   :  { %496 = vmatprep.subr.bf16.mxu0 %v569_v2 }
  0x12   :  { %p528_p3 = por %p527_p2, %p526_p1 }
  0x14   :  { %497 = vmatpush3.bf16.msra.mxu0 %v519_v30  ;;  %p529_p4 = pnand %p528_p3, %p522_p0 }
  0xd9   :  { %v93_v10 = vpop.f32.mrb[0].mxu0 }
  0xda   :  { %v472_v11 = vpop.f32.mrb[1].mxu0 }
  0xdb   :  { %v143_v12 = vpop.f32.mrb[0].mxu1  ;;  %v96_v14 = vpop.f32.mrb[2].mxu0 }
  0xdc   :  { %v144_v15 = vadd.f32 %v143_v12, %v93_v10  ;;  %v478_v16 = vpop.f32.mrb[1].mxu1  ;;  %v473_v17 = vpop.f32.mrb[3].mxu0 }
  0xdd   :  { %v146_v18 = vpop.f32.mrb[2].mxu1 }
  0xde   :  { %v156_v19 = vadd.f32 %v439_v13, %v144_v15  ;;  %v479_v20 = vpop.f32.mrb[3].mxu1 }
  0xe0   :  { %vm157_vm4 = vcmp.gt.f32.partialorder %v156_v19, 0.0  ;;  %v158_v21 = vmul.f32 0.2, %v156_v19 }
  0xe1   :  { %v203_v22 = vpop.f32.mrb[4].mxu0 }
  0xe2   :  { %v159_v23 = vsel %vm157_vm4, %v156_v19, %v158_v21  ;;  %v484_v24 = vpop.f32.mrb[5].mxu0 }
  0xe3   :  { %v160_v25 = vpack.c.bf16 %v159_v23, %v159_v23  ;;  %v206_v26 = vpop.f32.mrb[6].mxu0 }
  0xe4   :  { %v485_v27 = vpop.f32.mrb[7].mxu0 }
  0xe5   :  { %491 = vmatmul.mubr.msk.bf16.vlgmr.msra.gmra.mrb[4].mxu1 %vm221_vm5, %v160_v25 }
  0xe6   :  { %506 = vmatprep.mubr.msk.bf16.mxu1 %vm570_vm3, %v569_v2  ;;  %503 = vmatpush3.bf16.msra.mxu1 %v518_v29 }
  0xe7   :  { %504 = vmatprep.subr.bf16.mxu1 %v569_v2 }
  0xea   :  { %505 = vmatpush3.bf16.msra.mxu1 %v520_v31 }
 0x1b8   :  { %v259_v32 = vpop.f32.mrb[4].mxu1 }
 0x1b9   :  { %v260_v34 = vadd.f32 %v259_v32, %v203_v22  ;;  %v492_v35 = vpop.f32.mrb[5].mxu1 }
 0x1ba   :  { %v262_v36 = vpop.f32.mrb[6].mxu1 }
 0x1bb   :  { %v272_v37 = vadd.f32 %v444_v33, %v260_v34  ;;  %v493_v38 = vpop.f32.mrb[7].mxu1 }
 0x1bd   :  { %vm273_vm6 = vcmp.gt.f32.partialorder %v272_v37, 0.0  ;;  %v274_v39 = vmul.f32 0.2, %v272_v37 }
 0x1bf   :  { %v275_v40 = vsel %vm273_vm6, %v272_v37, %v274_v39 }
 0x1c0   :  { %v276_v41 = vpack.c.bf16 %v275_v40, %v275_v40 }
 0x1c2   :  { %499 = vmatmul.mubr.msk.bf16.vlgmr.msra.gmra.mrb[8].mxu0 %vm221_vm5, %v276_v41  ;;  %507 = vmatmul.mubr.msk.bf16.vlgmr.msra.gmra.mrb[8].mxu1 %vm221_vm5, %v276_v41 }
 0x295   :  { %v337_v44 = vpop.f32.mrb[8].mxu0  ;;  %v401_v45 = vpop.f32.mrb[8].mxu1 }
 0x296   :  { %v338_v46 = vadd.f32 %v445_v42, %v337_v44  ;;  %v402_v47 = vadd.f32 %v449_v43, %v401_v45  ;;  %v500_v48 = vpop.f32.mrb[9].mxu0  ;;  %v508_v49 = vpop.f32.mrb[9].mxu1 }
 0x297   :  { %v340_v50 = vpop.f32.mrb[10].mxu0  ;;  %v404_v51 = vpop.f32.mrb[10].mxu1 }
 0x298   :  { %343 = vst.msk [vmem:[#allocation2] sm:$0xff] %vm51_vm1, %v338_v46  ;;  %407 = vst.msk [vmem:[#allocation4] sm:$0xff] %vm51_vm1, %v402_v47  ;;  %v501_v52 = vpop.f32.mrb[11].mxu0  ;;  %v509_v53 = vpop.f32.mrb[11].mxu1 }
 0x299   :  { %532 = shalt.err (!%p529_p4)
}
 0x29a   :  { %s533_s3 = scalar_lea.hbm %s744_s12, 128 }
 0x29b   :  { %p534_p5 = scmp.ne.s32.totalorder %s744_s12, %s533_s3  ;;  %p537_p6 = scmp.lt.u32.totalorder %s533_s3, %s744_s12 }
 0x29d   :  { %p539_p7 = pnand %p537_p6, %p534_p5 }
 0x29f   :  { %542 = shalt.err (!%p539_p7)
}
 0x2a0   :  { %417 = dma.vmem_to_hbm [thread:$0]  %s415_s29, 128, %s744_s12, [#allocation3]  }
 0x2a1   :  { %s543_s18 = scalar_lea.vmem %s699_s14, 128  ;;  %p548_p9 = scmp.lt.s32.totalorder %s699_s14, %s699_s14 }
 0x2a2   :  { %p544_p8 = scmp.ne.s32.totalorder %s699_s14, %s543_s18  ;;  %p549_p10 = scmp.lt.s32.totalorder %s543_s18, %s543_s18 }
 0x2a4   :  { %p550_p11 = por %p549_p10, %p548_p9 }
 0x2a6   :  { %p551_p12 = pnand %p550_p11, %p544_p8 }
 0x2a8   :  { %554 = shalt.err (!%p551_p12)
}
 0x2a9   :  { %s555_s19 = scalar_lea.hbm %s745_s13, 128 }
 0x2aa   :  { %p556_p13 = scmp.ne.s32.totalorder %s745_s13, %s555_s19  ;;  %p559_p0 = scmp.lt.u32.totalorder %s555_s19, %s745_s13 }
 0x2ac   :  { %p561_p1 = pnand %p559_p0, %p556_p13 }
 0x2ae   :  { %564 = shalt.err (!%p561_p1)
}
 0x2af   :  { %427 = dma.vmem_to_hbm [thread:$0]  %s699_s14, 128, %s745_s13, [#allocation5]  }
 0x2b0   :  { %565 = dma.done.wait [#allocation3], 128  }
 0x2b1   :  { %566 = vsyncadd [#allocation3], 4294967168 }
 0x2b2   :  { %567 = dma.done.wait [#allocation5], 128  }
 0x2b3   :  { %568 = vsyncadd [#allocation5], 4294967168 }
 0x2b4   :  { %434 = vsyncpa [#allocation3], 1 }
 0x2b5   :  { %435 = vsyncpa [#allocation5], 1 }

</bundles_post_ra>
